<compile_context>
chip_gen: v7x
topology: tpu7x:2x2x1
jax: 0.10.0
libtpu: 0.0.40
codegen_flags: <defaults>
</compile_context>

<pallas_src>
import jax
import jax.numpy as jnp
from jax.experimental import pallas as pl
from jax.experimental.pallas import tpu as pltpu


def _round_up(x, m):
    return ((x + m - 1) // m) * m


def _vmem_capacity_bytes():
    """Physical per-core VMEM; conservative 64 MiB fallback (v7x)."""
    cap = 64 << 20
    try:
        info = pltpu.get_tpu_info()
        cap = int(getattr(info, "vmem_capacity_bytes", cap) or cap)
    except Exception:
        pass
    return cap


def _row_align(compute_dtype):
    """Sublane alignment for the row tile: 8 (f32), 16 (bf16), 32 (8-bit)."""
    nbytes = jnp.dtype(compute_dtype).itemsize
    if nbytes >= 4:
        return 8
    if nbytes == 2:
        return 16
    return 32


def _tile_bytes(tm, tf, d_model, cbytes, obytes):
    """Scoped-VMEM footprint estimate for one (tm, tf) configuration."""
    w01 = 2 * d_model * (2 * tf) * cbytes        # fused gate+lin slab (dbl-buffered)
    wo = 2 * tf * d_model * cbytes               # wo^T slab (dbl-buffered)
    xin = 2 * tm * d_model * cbytes              # activation rows (dbl-buffered)
    out = 2 * tm * d_model * obytes              # output rows (dbl-buffered)
    acc = tm * d_model * 4                       # f32 accumulator scratch
    # In-kernel intermediates: h01 f32 (tm, 2tf), gate*lin f32 (tm, tf),
    # cast of h to compute dtype (tm, tf).
    interm = tm * (2 * tf) * 4 + tm * tf * (4 + cbytes)
    return w01 + wo + xin + out + acc + interm


def _select_tiles(M, d_model, d_ff, compute_dtype, out_dtype, tm, tf):
    cbytes = jnp.dtype(compute_dtype).itemsize
    obytes = jnp.dtype(out_dtype).itemsize
    phys = _vmem_capacity_bytes()
    budget = max(phys - (12 << 20), 24 << 20)    # generation-aware, not a 64 MiB clamp
    align = _row_align(compute_dtype)

    # Row tile: MXU-filling target (512 keeps v6e/v7x compute-bound on weight
    # streaming for large M), shrunk + aligned for small inputs.
    tm_target = tm if tm is not None else 512
    tm_eff = min(_round_up(tm_target, align), _round_up(max(M, align), align))

    # d_ff tile: largest 128-multiple that fits the VMEM budget; prefer exact
    # divisors of d_ff (no padding) and collapse to one step when possible.
    dff128 = _round_up(d_ff, 128)
    if tf is not None:
        tf_eff = min(_round_up(tf, 128), dff128)
    else:
        cands = [dff128] + [t for t in (4096, 2048, 1024, 512, 256, 128)
                            if t < dff128 and dff128 % t == 0]
        tf_eff = 128
        for cand in cands:
            if _tile_bytes(tm_eff, cand, d_model, cbytes, obytes) <= budget:
                tf_eff = cand
                break

    # Shrink the row tile if even this tf does not fit (huge d_model edge case).
    while tm_eff > align and _tile_bytes(tm_eff, tf_eff, d_model, cbytes, obytes) > budget:
        tm_eff = max(align, _round_up(tm_eff // 2, align))

    M_pad = _round_up(max(M, 1), tm_eff)

    # v7x megacore: make sure the "parallel" row axis has >= 2 tiles when the
    # single tile is large enough to be worth splitting across 2 TensorCores.
    if tm is None and M_pad // tm_eff == 1 and tm_eff >= 256:
        tm_eff = _round_up((tm_eff + 1) // 2, align)
        M_pad = _round_up(max(M, 1), tm_eff)

    need = _tile_bytes(tm_eff, tf_eff, d_model, cbytes, obytes)
    vmem_limit = int(min(max(int(need * 1.4) + (4 << 20), 32 << 20),
                         phys - (4 << 20)))
    return tm_eff, tf_eff, M_pad, vmem_limit


def prepare_t5_ffn_weights(w0_t, w1_t, wo_t, *, tf_eff, compute_dtype):
    """One-time weight prep (hoist OFFLINE in deployment): cast to the compute
    dtype, zero-pad d_ff to a multiple of tf_eff, and interleave wi_0^T /
    wi_1^T per tf-slab so each reduction step reads one fused
    (d_model, 2*tf_eff) slab (single MXU pass for gate + linear)."""
    d_model, d_ff = w0_t.shape
    dff_pad = _round_up(d_ff, tf_eff)
    w0 = w0_t.astype(compute_dtype)
    w1 = w1_t.astype(compute_dtype)
    wo = wo_t.astype(compute_dtype)
    if dff_pad != d_ff:
        pad = dff_pad - d_ff
        w0 = jnp.pad(w0, ((0, 0), (0, pad)))
        w1 = jnp.pad(w1, ((0, 0), (0, pad)))
        wo = jnp.pad(wo, ((0, pad), (0, 0)))   # zero rows -> zero contribution
    n_f = dff_pad // tf_eff
    w01 = jnp.concatenate(
        [w0.reshape(d_model, n_f, tf_eff), w1.reshape(d_model, n_f, tf_eff)],
        axis=2,
    ).reshape(d_model, n_f * 2 * tf_eff)
    return w01, wo, dff_pad


def _make_ffn_kernel(tf_eff):
    def kernel(x_ref, w01_ref, wo_ref, o_ref, acc_ref):
        # x_ref  : (tm, d_model)        activation row tile
        # w01_ref: (d_model, 2*tf)      fused [wi_0^T | wi_1^T] slab for step f
        # wo_ref : (tf, d_model)        wo^T row slab for step f
        # o_ref  : (tm, d_model)        output row tile (written on last step)
        # acc_ref: (tm, d_model) f32    accumulator across the d_ff grid axis
        f = pl.program_id(1)

        @pl.when(f == 0)
        def _init():
            acc_ref[...] = jnp.zeros_like(acc_ref)

        # One fused MXU pass for both projections, f32 accumulation.
        h01 = jnp.dot(x_ref[...], w01_ref[...],
                      preferred_element_type=jnp.float32)        # (tm, 2*tf)
        h_gate = jnp.maximum(h01[:, :tf_eff], 0.0)               # ReLU gate
        h_lin = h01[:, tf_eff:]
        h = (h_gate * h_lin).astype(wo_ref.dtype)                # torch cast-to-wo-dtype
        # TODO(synk): dropout omitted (inference / eval-mode identity).

        acc_ref[...] += jnp.dot(h, wo_ref[...],
                                preferred_element_type=jnp.float32)

        @pl.when(f == pl.num_programs(1) - 1)
        def _finalize():
            o_ref[...] = acc_ref[...].astype(o_ref.dtype)

    return kernel


def t5_dense_gated_act_dense(x, w0_t, w1_t, wo_t, *, tm=None, tf=None,
                             compute_dtype=jnp.bfloat16):
    """T5 gated-FFN forward.

    x    : [B, S, d_model]
    w0_t : [d_model, d_ff]   (wi_0.weight.T, i.e. [in, out] layout)
    w1_t : [d_model, d_ff]   (wi_1.weight.T)
    wo_t : [d_ff, d_model]   (wo.weight.T)
    """
    B, S, d_model = x.shape
    d_ff = w0_t.shape[1]
    M = B * S
    out_dtype = x.dtype

    tm_eff, tf_eff, M_pad, vmem_limit = _select_tiles(
        M, d_model, d_ff, compute_dtype, out_dtype, tm, tf)

    # TODO(synk): in deployment, call prepare_t5_ffn_weights once offline (the
    # per-call cast/fuse re-reads all FFN weights); inlined here so the script
    # is self-contained.
    w01, wo_p, dff_pad = prepare_t5_ffn_weights(
        w0_t, w1_t, wo_t, tf_eff=tf_eff, compute_dtype=compute_dtype)

    x2 = x.reshape(M, d_model).astype(compute_dtype)
    if M_pad != M:
        x2 = jnp.pad(x2, ((0, M_pad - M), (0, 0)))

    grid = (M_pad // tm_eff, dff_pad // tf_eff)
    cbytes = jnp.dtype(compute_dtype).itemsize

    cost = pl.CostEstimate(
        flops=6 * M_pad * d_model * dff_pad,
        transcendentals=0,
        bytes_accessed=(
            M_pad * d_model * (cbytes + jnp.dtype(out_dtype).itemsize)
            + (int(w01.size) + int(wo_p.size)) * cbytes * (M_pad // tm_eff)
        ),
    )

    out2 = pl.pallas_call(
        _make_ffn_kernel(tf_eff),
        out_shape=jax.ShapeDtypeStruct((M_pad, d_model), out_dtype),
        grid_spec=pltpu.PrefetchScalarGridSpec(
            num_scalar_prefetch=0,
            grid=grid,
            in_specs=[
                pl.BlockSpec((tm_eff, d_model), lambda i, f: (i, 0)),       # x rows
                pl.BlockSpec((d_model, 2 * tf_eff), lambda i, f: (0, f)),   # fused wi slab
                pl.BlockSpec((tf_eff, d_model), lambda i, f: (f, 0)),       # wo^T slab
            ],
            out_specs=pl.BlockSpec((tm_eff, d_model), lambda i, f: (i, 0)),
            scratch_shapes=[pltpu.VMEM((tm_eff, d_model), jnp.float32)],
        ),
        compiler_params=pltpu.CompilerParams(
            dimension_semantics=("parallel", "arbitrary"),
            vmem_limit_bytes=vmem_limit,
        ),
        cost_estimate=cost,
    )(x2, w01, wo_p)

    if M_pad != M:
        out2 = out2[:M]
    return out2.reshape(B, S, d_model)


if __name__ == "__main__":
    # Small config: batch=2, seq=8, d_model=32, d_ff=256.
    B, S, d_model, d_ff = 2, 8, 32, 256

    key = jax.random.PRNGKey(0)
    kx, k0, k1, ko = jax.random.split(key, 4)

    x = jax.random.normal(kx, (B, S, d_model), dtype=jnp.float32)
    # nn.Linear(in, out).weight has shape (out, in); we store the transpose
    # [in, out] for row-major matmuls in the kernel.
    w0_t = jax.random.normal(k0, (d_model, d_ff), dtype=jnp.float32) / jnp.sqrt(
        jnp.float32(d_model))
    w1_t = jax.random.normal(k1, (d_model, d_ff), dtype=jnp.float32) / jnp.sqrt(
        jnp.float32(d_model))
    wo_t = jax.random.normal(ko, (d_ff, d_model), dtype=jnp.float32) / jnp.sqrt(
        jnp.float32(d_ff))

    # Reference in plain JAX (matches the PyTorch f32 eval-mode forward).
    x2 = x.reshape(-1, d_model)
    ref = ((jnp.maximum(x2 @ w0_t, 0.0) * (x2 @ w1_t)) @ wo_t).reshape(B, S, d_model)

    # f32 compute path with tf=128 -> exercises the 2-step d_ff reduction axis.
    out = t5_dense_gated_act_dense(x, w0_t, w1_t, wo_t, tf=128,
                                   compute_dtype=jnp.float32)
    out = jax.block_until_ready(out)
    assert out.shape == (B, S, d_model)
    assert jnp.allclose(out, ref, atol=1e-2, rtol=1e-2), "mismatch vs reference"

    # Default deployment path: bf16 compute, f32 accumulation, budget-driven tf
    # (collapses to a single reduction step for this small d_ff).
    out_bf16 = jax.block_until_ready(t5_dense_gated_act_dense(x, w0_t, w1_t, wo_t))
    err = jnp.max(jnp.abs(out_bf16.astype(jnp.float32) - ref))
    scale = jnp.max(jnp.abs(ref)) + 1e-6
    assert float(err / scale) < 1e-1, "bf16 path diverged too far from f32 reference"

    print("KERNEL_OK")
</pallas_src>

<mosaic_0001>
module attributes {stable_mosaic.version = 11 : i64} {
  func.func @kernel(%arg0: i32, %arg1: i32, %arg2: memref<16x32xf32, #tpu.memory_space<vmem>>, %arg3: memref<32x256xf32, #tpu.memory_space<vmem>>, %arg4: memref<128x32xf32, #tpu.memory_space<vmem>>, %arg5: memref<16x32xf32, #tpu.memory_space<vmem>>, %arg6: memref<16x32xf32, #tpu.memory_space<vmem>>) attributes {dimension_semantics = [#tpu.dimension_semantics<parallel>, #tpu.dimension_semantics<arbitrary>], iteration_bounds = array<i64: 1, 2>, scalar_prefetch = 0 : i64, scratch_operands = 1 : i64, tpu.core_type = #tpu.core_type<tc>, window_params = [{transform_indices = @transform_0, window_bounds = array<i64: 16, 32>}, {transform_indices = @transform_1, window_bounds = array<i64: 32, 256>}, {transform_indices = @transform_2, window_bounds = array<i64: 128, 32>}, {transform_indices = @transform_3, window_bounds = array<i64: 16, 32>}]} {
    %c0_i32 = arith.constant 0 : i32
    %0 = arith.cmpi eq, %arg1, %c0_i32 : i32
    %1 = arith.extui %0 : i1 to i32
    %c0_i32_0 = arith.constant 0 : i32
    %2 = arith.cmpi ne, %1, %c0_i32_0 : i32
    scf.if %2 {
      %cst_13 = arith.constant 0.000000e+00 : f32
      %19 = vector.broadcast %cst_13 : f32 to vector<16x32xf32>
      %c0_14 = arith.constant 0 : index
      %c0_15 = arith.constant 0 : index
      %20 = vector.load %arg6[%c0_14, %c0_15] : memref<16x32xf32, #tpu.memory_space<vmem>>, vector<16x32xf32>
      tpu.vector_store %arg6[%c0_14, %c0_15], %19 {strides = array<i32>} : memref<16x32xf32, #tpu.memory_space<vmem>>, vector<16x32xf32>,
    } else {
    }
    %c0 = arith.constant 0 : index
    %c0_1 = arith.constant 0 : index
    %3 = vector.load %arg2[%c0, %c0_1] : memref<16x32xf32, #tpu.memory_space<vmem>>, vector<16x32xf32>
    %c0_2 = arith.constant 0 : index
    %c0_3 = arith.constant 0 : index
    %4 = vector.load %arg3[%c0_2, %c0_3] : memref<32x256xf32, #tpu.memory_space<vmem>>, vector<32x256xf32>
    %cst = arith.constant dense<0.000000e+00> : vector<16x256xf32>
    %5 = tpu.matmul %3, %4, %cst {dimension_numbers = #tpu.dot_dimension_numbers<[1], [0], [0], [1], [0, 0, 1, 1], [], []>} : vector<16x32xf32>, vector<32x256xf32>, vector<16x256xf32> -> vector<16x256xf32>
    %6 = vector.extract_strided_slice %5 {offsets = [0, 0], sizes = [16, 128], strides = [1, 1]} : vector<16x256xf32> to vector<16x128xf32>
    %cst_4 = arith.constant 0.000000e+00 : f32
    %7 = vector.broadcast %cst_4 : f32 to vector<16x128xf32>
    %8 = arith.maximumf %6, %7 : vector<16x128xf32>
    %9 = vector.extract_strided_slice %5 {offsets = [0, 128], sizes = [16, 128], strides = [1, 1]} : vector<16x256xf32> to vector<16x128xf32>
    %10 = arith.mulf %8, %9 : vector<16x128xf32>
    %c0_5 = arith.constant 0 : index
    %c0_6 = arith.constant 0 : index
    %11 = vector.load %arg6[%c0_5, %c0_6] : memref<16x32xf32, #tpu.memory_space<vmem>>, vector<16x32xf32>
    %c0_7 = arith.constant 0 : index
    %c0_8 = arith.constant 0 : index
    %12 = vector.load %arg4[%c0_7, %c0_8] : memref<128x32xf32, #tpu.memory_space<vmem>>, vector<128x32xf32>
    %cst_9 = arith.constant dense<0.000000e+00> : vector<16x32xf32>
    %13 = tpu.matmul %10, %12, %cst_9 {dimension_numbers = #tpu.dot_dimension_numbers<[1], [0], [0], [1], [0, 0, 1, 1], [], []>} : vector<16x128xf32>, vector<128x32xf32>, vector<16x32xf32> -> vector<16x32xf32>
    %14 = arith.addf %11, %13 : vector<16x32xf32>
    %c0_10 = arith.constant 0 : index
    %c0_11 = arith.constant 0 : index
    %15 = vector.load %arg6[%c0_10, %c0_11] : memref<16x32xf32, #tpu.memory_space<vmem>>, vector<16x32xf32>
    tpu.vector_store %arg6[%c0_10, %c0_11], %14 {strides = array<i32>} : memref<16x32xf32, #tpu.memory_space<vmem>>, vector<16x32xf32>,
    %c1_i32 = arith.constant 1 : i32
    %16 = arith.cmpi eq, %arg1, %c1_i32 : i32
    %17 = arith.extui %16 : i1 to i32
    %c0_i32_12 = arith.constant 0 : i32
    %18 = arith.cmpi ne, %17, %c0_i32_12 : i32
    scf.if %18 {
      %c0_13 = arith.constant 0 : index
      %c0_14 = arith.constant 0 : index
      %19 = vector.load %arg6[%c0_13, %c0_14] : memref<16x32xf32, #tpu.memory_space<vmem>>, vector<16x32xf32>
      %c0_15 = arith.constant 0 : index
      %c0_16 = arith.constant 0 : index
      %20 = vector.load %arg5[%c0_15, %c0_16] : memref<16x32xf32, #tpu.memory_space<vmem>>, vector<16x32xf32>
      tpu.vector_store %arg5[%c0_15, %c0_16], %19 {strides = array<i32>} : memref<16x32xf32, #tpu.memory_space<vmem>>, vector<16x32xf32>,
    } else {
    }
    return
  }
  func.func @transform_0(%arg0: i32, %arg1: i32) -> (i32, i32) {
    %c0_i32 = arith.constant 0 : i32
    %c0_i32_0 = arith.constant 0 : i32
    return %arg0, %c0_i32 : i32, i32
  }
  func.func @transform_1(%arg0: i32, %arg1: i32) -> (i32, i32) {
    %c0_i32 = arith.constant 0 : i32
    %c0_i32_0 = arith.constant 0 : i32
    return %c0_i32, %arg1 : i32, i32
  }
  func.func @transform_2(%arg0: i32, %arg1: i32) -> (i32, i32) {
    %c0_i32 = arith.constant 0 : i32
    %c0_i32_0 = arith.constant 0 : i32
    return %arg1, %c0_i32 : i32, i32
  }
  func.func @transform_3(%arg0: i32, %arg1: i32) -> (i32, i32) {
    %c0_i32 = arith.constant 0 : i32
    %c0_i32_0 = arith.constant 0 : i32
    return %arg0, %c0_i32 : i32, i32
  }
}

</mosaic_0001>

<bundles_post_ra>
// kernel: tpu_custom_call.1
= control target key start
LH: loop header
LB: loop body
LE: loop exit
PB: predicated region body
PF: predicated region fallthrough
CT: control target
= control target key end

     0   :  { %8 = vsyncpa [#allocation5], 0  ;;  %s818_s12 = smov 0   ;;  %s820_s13 = smov 0   ;;  %s944_s0 = inlined_call_operand.vmem [shape: f32[16,32], index: 0, kind: input, shape index: {}]   ;;  %s945_s1 = inlined_call_operand.vmem [shape: f32[32,512], index: 1, kind: input, shape index: {}]   ;;  %s946_s2 = inlined_call_operand.vmem [shape: f32[256,32], index: 2, kind: input, shape index: {}]   ;;  %s947_s3 = inlined_call_operand.hbm [shape: f32[16,32], index: 3, kind: output, shape index: {}]  }
   0x1   :  { %s822_s14 = smov 0   ;;  %s824_s15 = smov 0  }
   0x2   :  { %s826_s16 = smov 0  }
   0x3 LB: > { %s559_s17 = sadd.s32 4294967295, %s791_s16   ;;  %s23_s18 = sadd.s32 1, %s787_s15  ;;  %s791_s16 = sphi %s826_s16, %s14_s16   ;;  %s787_s15 = sphi %s824_s15, %s952_s15   ;;  %s783_s14 = sphi %s822_s14, %s951_s14   ;;  %s779_s13 = sphi %s820_s13, %s950_s13   ;;  %s775_s12 = sphi %s818_s12, %s949_s12  }
   0x4   : > { %p24_p0 = scmp.ge.s32.totalorder %s23_s18, 2  ;;  %p66_p1 = scmp.ne.s32.totalorder %s779_s13, %s775_s12 }
   0x5   : > { %p67_p2 = scmp.eq.s32.totalorder %s791_s16, 0  ;;  %s59_s20 = sadd.s32 1, %s779_s13 }
   0x6   : > { %s954_s18 = smov (%p24_p0, %s23_s18), 0  ;;  %p562_p5 = scmp.ge.s32.totalorder %s791_s16, 2 }
   0x7   : > { %p68_p3 = por %p67_p2, %p66_p1  ;;  %s56_s19 = ssub.s32 %s787_s15, %s954_s18 }
   0x8   : > { %p57_p4 = scmp.eq.s32.totalorder %s56_s19, 0  ;;  %153 = sbr.rel (%p562_p5) target bundleno = 23 (0x17), region = 20 }
   0xa   : > { %s854_s21 = scalar_select %p57_p4, %s779_s13, %s59_s20  }
   0xf   : > { %156 = sbr.rel (!%p68_p3) target bundleno = 23 (0x17), region = 24  ;;  %s158_s22 = sand.u32 (%p68_p3), 1, %s779_s13  }
  0x10   : > { %s578_s23 = sshll.u32 (%p68_p3), %s787_s15, 4  ;;  %s563_s24 = sshll.u32 (%p68_p3), %s158_s22, 6 }
  0x11   : > { %s163_s27 = scalar_lea.vmem (%p68_p3), %s945_s1, %s578_s23  ;;  %s160_s28 = scalar_lea.vmem (%p68_p3), [#allocation3], %s563_s24 }
  0x12   : > { %v176_v0 = vld [vmem:[%s163_s27] sm:$0xff] (%p68_p3)  ;;  %v178_v1 = vld [vmem:[%s163_s27 + $0x8] sm:$0xff] (%p68_p3) }
  0x13   : > { %v180_v2 = vld [vmem:[%s163_s27 + $0x20] sm:$0xff] (%p68_p3)  ;;  %177 = vst [vmem:[%s160_s28] sm:$0xff] (%p68_p3), %v176_v0  ;;  %179 = vst [vmem:[%s160_s28 + $0x8] sm:$0xff] (%p68_p3), %v178_v1  ;;  %v182_v3 = vld [vmem:[%s163_s27 + $0x28] sm:$0xff] (%p68_p3) }
  0x14   : > { %181 = vst [vmem:[%s160_s28 + $0x10] sm:$0xff] (%p68_p3), %v180_v2  ;;  %v184_v4 = vld [vmem:[%s163_s27 + $0x40] sm:$0xff] (%p68_p3)  ;;  %v186_v5 = vld [vmem:[%s163_s27 + $0x48] sm:$0xff] (%p68_p3)  ;;  %183 = vst [vmem:[%s160_s28 + $0x18] sm:$0xff] (%p68_p3), %v182_v3 }
  0x15   : > { %185 = vst [vmem:[%s160_s28 + $0x20] sm:$0xff] (%p68_p3), %v184_v4  ;;  %187 = vst [vmem:[%s160_s28 + $0x28] sm:$0xff] (%p68_p3), %v186_v5  ;;  %v188_v6 = vld [vmem:[%s163_s27 + $0x60] sm:$0xff] (%p68_p3)  ;;  %v190_v7 = vld [vmem:[%s163_s27 + $0x68] sm:$0xff] (%p68_p3) }
  0x16   : > { %189 = vst [vmem:[%s160_s28 + $0x30] sm:$0xff] %v188_v6  ;;  %191 = vst [vmem:[%s160_s28 + $0x38] sm:$0xff] %v190_v7 }
  0x17 PF: > { %p566_p6 = scmp.ge.s32.totalorder %s791_s16, 1  ;;  %p205_p7 = scmp.lt.s32.totalorder %s791_s16, 3 }
  0x19   : > { %p206_p8 = pnand %p566_p6, %p205_p7 }
  0x1a   : > { %s212_s29 = sand.u32 (!%p206_p8), 1, %s775_s12   ;;  %s568_s30 = sshll.u32 (!%p206_p8), %s783_s14, 4 }
  0x1b   : > { %209 = sbr.rel (%p206_p8) target bundleno = 522 (0x20a), region = 51  ;;  %s567_s4 = sshll.u32 (!%p206_p8), %s212_s29, 6 }
  0x1c   : > { %p248_p9 = scmp.lt.s32.totalorder (!%p206_p8), %s568_s30, 31  ;;  %s214_s9 = scalar_lea.vmem (!%p206_p8), [#allocation3], %s567_s4 }
  0x1d   : > { %p570_p10 = scmp.ne.s32.totalorder (!%p206_p8), %s783_s14, 0 }
  0x22   : > { %s956_s30 = smov (!%p248_p9, %s568_s30), 31  ;;  %257 = sbr.rel (%p570_p10) target bundleno = 41 (0x29), region = 59 }
  0x23   : > { %s569_s5 = sshll.u32 %s956_s30, 3  ;;  %vm258_vm0 = vcmask (!%p570_p10), 261120   ;;  %v793_v8 = vmov (!%p570_p10), 0.0  }
  0x24   : > { %s869_s8 = scalar_lea.vmem %s946_s2, %s569_s5  ;;  %259 = vst.msk [vmem:[#allocation2] sm:$0xff] (!%p570_p10), %vm258_vm0, %v793_v8  ;;  %260 = vst.msk [vmem:[#allocation2 + $0x8] sm:$0xff] (!%p570_p10), %vm258_vm0, %v793_v8 }
  0x29 PF: > { %v264_v9 = vld [vmem:[%s214_s9 + $0x8] sm:$0xff]  ;;  %v266_v10 = vld [vmem:[%s214_s9 + $0x18] sm:$0xff]  ;;  %v263_v11 = vld [vmem:[%s214_s9] sm:$0xff]  ;;  %v794_v16 = vmov 0.0   ;;  %vm271_vm1 = vcmask 261120   ;;  %p573_p11 = scmp.ne.s32.totalorder %s783_s14, 1 }
  0x2a   : > { %v632_v12 = vpack.c.bf16 %v266_v10, %v264_v9  ;;  %v265_v13 = vld [vmem:[%s214_s9 + $0x10] sm:$0xff]  ;;  %v268_v14 = vld [vmem:[%s214_s9 + $0x28] sm:$0xff]  ;;  %v270_v15 = vld [vmem:[%s214_s9 + $0x38] sm:$0xff]  ;;  %342 = vmatprep.mubr.f32.mxu0 %v794_v16 }
  0x2b   : > { %v634_v17 = vpack.c.bf16 %v265_v13, %v263_v11  ;;  %v636_v18 = vpack.c.bf16 %v270_v15, %v268_v14  ;;  %v267_v19 = vld [vmem:[%s214_s9 + $0x20] sm:$0xff]  ;;  %v269_v20 = vld [vmem:[%s214_s9 + $0x30] sm:$0xff]  ;;  %v362_v22 = vld [vmem:[%s869_s8 + $0x8] sm:$0xff] }
  0x2c   : > { %633 = vmatprep.subr.bf16.mxu0 %v632_v12  ;;  %v361_v21 = vld [vmem:[%s869_s8] sm:$0xff]  ;;  %v638_v23 = vpack.c.bf16 %v269_v20, %v267_v19  ;;  %v363_v25 = vld [vmem:[%s869_s8 + $0x10] sm:$0xff]  ;;  %v364_v26 = vld [vmem:[%s869_s8 + $0x18] sm:$0xff] }
  0x2d   : > { %635 = vmatpush1.bf16.msra.mxu0 %v634_v17  ;;  %v640_v24 = vpack.c.bf16 %v362_v22, %v361_v21  ;;  %v644_v27 = vpack.c.bf16 %v364_v26, %v363_v25  ;;  %v365_v28 = vld [vmem:[%s869_s8 + $0x20] sm:$0xff]  ;;  %v366_v29 = vld [vmem:[%s869_s8 + $0x28] sm:$0xff]  ;;  %v367_v32 = vld [vmem:[%s869_s8 + $0x30] sm:$0xff] }
  0x2e   : > { %637 = vmatprep.subr.bf16.mxu0 %v636_v18  ;;  %v261_v30 = vld [vmem:[%s944_s0] sm:$0xff]  ;;  %v648_v31 = vpack.c.bf16 %v366_v29, %v365_v28  ;;  %v368_v33 = vld [vmem:[%s869_s8 + $0x38] sm:$0xff]  ;;  %v262_v34 = vld [vmem:[%s944_s0 + $0x8] sm:$0xff] }
  0x2f   : > { %641 = vmatprep.subr.bf16.mxu1 %v640_v24  ;;  %v652_v35 = vpack.c.bf16 %v368_v33, %v367_v32  ;;  %v369_v36 = vld [vmem:[%s869_s8 + $0x40] sm:$0xff]  ;;  %v370_v37 = vld [vmem:[%s869_s8 + $0x48] sm:$0xff]  ;;  %v371_v39 = vld [vmem:[%s869_s8 + $0x50] sm:$0xff] }
  0x30   : > { %643 = vmatpush3.bf16.msra.mxu1 %v640_v24  ;;  %v656_v38 = vpack.c.bf16 %v370_v37, %v369_v36  ;;  %v372_v40 = vld [vmem:[%s869_s8 + $0x58] sm:$0xff]  ;;  %v373_v42 = vld [vmem:[%s869_s8 + $0x60] sm:$0xff]  ;;  %v374_v43 = vld [vmem:[%s869_s8 + $0x68] sm:$0xff] }
  0x31   : > { %639 = vmatpush1.bf16.msra.mxu0 %v638_v23  ;;  %645 = vmatprep.subr.bf16.mxu1 %v644_v27  ;;  %v660_v41 = vpack.c.bf16 %v372_v40, %v371_v39  ;;  %v664_v44 = vpack.c.bf16 %v374_v43, %v373_v42  ;;  %v375_v45 = vld [vmem:[%s869_s8 + $0x70] sm:$0xff]  ;;  %v376_v46 = vld [vmem:[%s869_s8 + $0x78] sm:$0xff]  ;;  %v360_v56 = vld [vmem:[#allocation2 + $0x8] sm:$0xff] }
  0x32   : > { %v668_v47 = vpack.c.bf16 %v376_v46, %v375_v45  ;;  %v359_v57 = vld [vmem:[#allocation2] sm:$0xff] }
  0x34   : > { %571 = vmatmul.mubr.msk.f32.vlgmr.msra.gmra.mrb[0].mxu0 %vm271_vm1, %v261_v30  ;;  %647 = vmatpush3.bf16.msra.mxu1 %v644_v27 }
  0x35   : > { %348 = vmatprep.mubr.f32.mxu0 %v794_v16  ;;  %649 = vmatprep.subr.bf16.mxu1 %v648_v31 }
  0x38   : > { %572 = vmatmul.mubr.msk.f32.gmra.mrb[2].mxu0 %vm271_vm1, %v262_v34  ;;  %651 = vmatpush3.bf16.msra.mxu1 %v648_v31 }
  0x39   : > { %653 = vmatprep.subr.bf16.mxu1 %v652_v35 }
  0x3c   : > { %655 = vmatpush3.bf16.msra.mxu1 %v652_v35 }
  0x3d   : > { %657 = vmatprep.subr.bf16.mxu1 %v656_v38 }
  0x40   : > { %659 = vmatpush3.bf16.msra.mxu1 %v656_v38 }
  0x41   : > { %661 = vmatprep.subr.bf16.mxu1 %v660_v41 }
  0x44   : > { %663 = vmatpush3.bf16.msra.mxu1 %v660_v41 }
  0x45   : > { %665 = vmatprep.subr.bf16.mxu1 %v664_v44 }
  0x48   : > { %667 = vmatpush3.bf16.msra.mxu1 %v664_v44 }
  0x49   : > { %669 = vmatprep.subr.bf16.mxu1 %v668_v47 }
  0x4c   : > { %671 = vmatpush3.bf16.msra.mxu1 %v668_v47 }
 0x107   : > { %v344_v48 = vpop.f32.mrb[0].mxu0 }
 0x108   : > { %v355_v49 = vmax.f32 %v344_v48, 0.0  ;;  %v346_v50 = vpop.f32.mrb[1].mxu0 }
 0x10a   : > { %v357_v51 = vmul.f32 %v355_v49, %v346_v50 }
 0x10b   : > { %v350_v52 = vpop.f32.mrb[2].mxu0 }
 0x10c   : > { %v356_v53 = vmax.f32 %v350_v52, 0.0  ;;  %v352_v54 = vpop.f32.mrb[3].mxu0  ;;  %629 = vmatprep.mubr.f32.mxu1 %v357_v51 }
 0x10e   : > { %v358_v55 = vmul.f32 %v356_v53, %v352_v54 }
 0x110   : > { %630 = vmatmul.mubr.f32.vlgmr.msra.gmra.mrb[0].mxu1 %v358_v55 }
 0x1e1   : > { %459 = sbr.rel (%p573_p11) target bundleno = 496 (0x1f0), region = 63 }
 0x1e3   : > { %v631_v58 = vpop.f32.mrb[0].mxu1 }
 0x1e4   : > { %v453_v59 = vadd.f32 %v631_v58, %v360_v56  ;;  %v443_v60 = vpop.f32.mrb[1].mxu1 }
 0x1e5   : > { %v452_v61 = vadd.f32 %v443_v60, %v359_v57 }
 0x1e6   : > { %455 = vst.msk [vmem:[#allocation2 + $0x8] sm:$0xff] %vm271_vm1, %v453_v59 }
 0x1e7   : > { %454 = vst.msk [vmem:[#allocation2] sm:$0xff] %vm271_vm1, %v452_v61 }
 0x1ed   : > { %v461_v63 = vld [vmem:[#allocation2 + $0x8] sm:$0xff] }
 0x1ee   : > { %v460_v62 = vld [vmem:[#allocation2] sm:$0xff]  ;;  %463 = vst.msk [vmem:[#allocation4 + $0x8] sm:$0xff] %vm271_vm1, %v461_v63 }
 0x1ef   : > { %462 = vst.msk [vmem:[#allocation4] sm:$0xff] %vm271_vm1, %v460_v62 }
 0x1f0 PF: > { %p903_p12 = scmp.eq.s32.totalorder %s559_s17, 1  ;;  %s795_s22 = smov [#allocation4]  }
 0x1f1   : > { %s473_s23 = sshll.u32 %s795_s22, 4  ;;  %s474_s23 = int_to_ptr.vmem [resolvable:$true] %s473_s23 }
 0x1f2   : > { %s723_s24 = scalar_lea.vmem %s474_s23, 256  ;;  %p730_p2 = scmp.lt.s32.totalorder %s474_s23, %s474_s23 }
 0x1f3   : > { %p724_p13 = scmp.ne.s32.totalorder %s474_s23, %s723_s24  ;;  %p731_p3 = scmp.lt.s32.totalorder %s723_s24, %s723_s24 }
 0x1f5   : > { %p725_p0 = pnand %p724_p13, %p903_p12  ;;  %p732_p4 = por %p731_p3, %p730_p2 }
 0x1f7   : > { %p726_p1 = pneg %p725_p0 }
 0x1f9   : > { %p733_p5 = pnand %p732_p4, %p726_p1 }
 0x1fb   : > { %736 = shalt.err (!%p733_p5)
}
 0x1fc   : > { %s737_s17 = scalar_lea.hbm %s947_s3, 256 }
 0x1fd   : > { %p738_p6 = scmp.ne.s32.totalorder %s947_s3, %s737_s17  ;;  %p743_p9 = scmp.lt.u32.totalorder %s737_s17, %s947_s3 }
 0x1ff   : > { %p739_p7 = pnand %p738_p6, %p903_p12 }
 0x201   : > { %p740_p8 = pneg %p739_p7 }
 0x203   : > { %p745_p10 = pnand %p743_p9, %p740_p8 }
 0x205   : > { %748 = shalt.err (!%p745_p10)
}
 0x206   : > { %s796_s30 = smov 128   ;;  %s797_s4 = smov 8  }
 0x207   : > { %673 = dma.vmem_to_hbm [thread:$0]  (%p903_p12), %s474_s23, 256, %s947_s3, [#allocation5], %s796_s30, %s796_s30, %s797_s4  }
 0x208   : > { %770 = dma.done.wait (%p903_p12), [#allocation5], 256  }
 0x209   : > { %772 = vsyncadd (%p903_p12), [#allocation5], 4294967040 }
 0x20a PF: > { %s14_s16 = sadd.s32 1, %s791_s16   ;;  %s949_s12 = smov %s779_s13 }
 0x20b   : > { %p11_p11 = scmp.ge.s32.totalorder %s14_s16, 4   ;;  %s950_s13 = smov %s854_s21 }
 0x20c   : > { %s951_s14 = smov %s787_s15  ;;  %s952_s15 = smov %s954_s18 }
 0x20d   :  { %13 = sbr.rel (!%p11_p11) target bundleno = 3 (0x3), region = 102 }
 0x214   :  { %489 = vsyncpa [#allocation5], 1 }
 0x215   :  { %491 = vsyncpa [#allocation5 + $0x1], 1 }

</bundles_post_ra>
